<compile_context>
chip_gen: v6e
topology: v6e:2x2x1
jax: 0.10.0
libtpu: 0.0.40
codegen_flags: <defaults>
</compile_context>

<pallas_src>
import functools

import jax
import jax.numpy as jnp
from jax.experimental import pallas as pl
from jax.experimental.pallas import tpu as pltpu

_LANE = 128          # lane width  (last-dim tiling unit)
_BF16_SUBLANE = 16   # one bf16 vreg is [16, 128]


def _round_up(n: int, m: int) -> int:
    return ((n + m - 1) // m) * m


def _cdiv(a: int, b: int) -> int:
    return -(-a // b)


# ---------------------------------------------------------------------------
# Kernel: fused MLP over one batch tile.
#   refs = (x_ref, w0, b0, w1, b1, ..., w_{L-1}, b_{L-1}, o_ref)
# ---------------------------------------------------------------------------
def _mlp_fused_kernel(*refs, n_layers: int):
    x_ref = refs[0]
    o_ref = refs[1 + 2 * n_layers]

    h = x_ref[...].astype(jnp.bfloat16)          # bf16 MXU inputs
    for i in range(n_layers):
        w = refs[1 + 2 * i][...]                 # [Din_p, Dout_p]  bf16
        b = refs[2 + 2 * i][...]                 # [1,    Dout_p]  f32
        y = jnp.dot(h, w, preferred_element_type=jnp.float32) + b
        if i < n_layers - 1:
            # f32 epilogue (VPU/EUP), bf16 again for the next MXU pass.
            h = jnp.tanh(y).astype(jnp.bfloat16)
        else:
            h = y
    o_ref[...] = h.astype(o_ref.dtype)


# ---------------------------------------------------------------------------
# Batch-tile selection
# ---------------------------------------------------------------------------
def _choose_batch_tile(B: int, tm_cap: int):
    """Pick (tm, b_pad): tm a multiple of 16, b_pad = tm * n_tiles hugging B.

    * Big tiles (target 512 rows) to push streamed x/o toward HBM roofline.
    * >= 2 grid steps when B > 128 so v7x's two TensorCores both get work
      (no-op cost on the single-TC v5e/v6e).
    * Tile re-balanced to cdiv(B, n_tiles) so padding waste stays small.
    """
    tm_cap = max(_BF16_SUBLANE,
                 (min(tm_cap, 1024) // _BF16_SUBLANE) * _BF16_SUBLANE)
    tm_target = min(tm_cap, 512)
    n_tiles = max(1, _cdiv(B, tm_target))
    if B > 128:
        n_tiles = max(n_tiles, 2)
    tm = min(_round_up(_cdiv(B, n_tiles), _BF16_SUBLANE), tm_cap)
    n_tiles = _cdiv(B, tm)
    return tm, tm * n_tiles


# ---------------------------------------------------------------------------
# Wrapper
# ---------------------------------------------------------------------------
def mlp_forward_pallas(x, padded_params, out_dim: int):
    """x: [B, Din] (unpadded). padded_params: list of (w_p bf16, b_p f32)."""
    B, Din = x.shape
    n_layers = len(padded_params)
    d0_p = padded_params[0][0].shape[0]
    dl_p = padded_params[-1][0].shape[1]

    # --- generation-aware VMEM budget -------------------------------------
    try:
        vmem_cap = int(pltpu.get_tpu_info().vmem_capacity_bytes)
    except Exception:
        vmem_cap = 64 * 1024 * 1024          # conservative (v7x-sized) fallback
    vmem_budget = int(vmem_cap * 0.75)       # ~96 MiB v5e/v6e, ~48 MiB v7x

    # Resident weights/biases: Buffered(1) => a single VMEM copy each.
    weight_bytes = sum(w.size * w.dtype.itemsize + b.size * b.dtype.itemsize
                       for w, b in padded_params)
    max_dout_p = max(w.shape[1] for w, _ in padded_params)

    # Per-row footprint of the streamed tiles + live intermediates:
    #   bf16 x tile (double-buffered) + bf16 o tile (double-buffered)
    #   + f32 accumulator + bf16 h of the widest layer epilogue.
    bytes_per_row = 2 * 2 * d0_p + 2 * 2 * dl_p + 6 * max_dout_p

    acts_budget = vmem_budget - weight_bytes - (2 << 20)   # 2 MiB slack
    tm_cap = max(_BF16_SUBLANE, acts_budget // bytes_per_row)
    tm, b_pad = _choose_batch_tile(B, tm_cap)

    # Zero-pad the input and stream it as bf16 (weights/bias padded with
    # zeros too, so results are unchanged).
    x_p = (jnp.zeros((b_pad, d0_p), jnp.bfloat16)
           .at[:B, :Din].set(x.astype(jnp.bfloat16)))

    in_specs = [pl.BlockSpec((tm, d0_p), lambda i: (i, 0))]
    operands = [x_p]

    flops = 0
    transcendentals = 0
    bytes_accessed = x_p.size * 2 + weight_bytes + b_pad * dl_p * 2

    for li, (w, b) in enumerate(padded_params):
        din_p, dout_p = w.shape
        # Constant index_map + Buffered(1): fetched once, single-buffered,
        # resident across all batch tiles.
        in_specs.append(pl.BlockSpec((din_p, dout_p), lambda i: (0, 0),
                                     pipeline_mode=pl.Buffered(1)))
        in_specs.append(pl.BlockSpec((1, dout_p), lambda i: (0, 0),
                                     pipeline_mode=pl.Buffered(1)))
        operands += [w, b]

        flops += 2 * b_pad * din_p * dout_p
        if li < n_layers - 1:
            transcendentals += b_pad * dout_p

    vmem_needed = weight_bytes + tm * bytes_per_row
    vmem_limit = int(min(vmem_budget, max(2 * vmem_needed, 16 * 1024 * 1024)))

    kernel = functools.partial(_mlp_fused_kernel, n_layers=n_layers)
    out_p = pl.pallas_call(
        kernel,
        out_shape=jax.ShapeDtypeStruct((b_pad, dl_p), jnp.bfloat16),
        grid=(b_pad // tm,),
        in_specs=in_specs,
        out_specs=pl.BlockSpec((tm, dl_p), lambda i: (i, 0)),
        compiler_params=pltpu.CompilerParams(
            dimension_semantics=("parallel",),   # megacore split on v7x
            vmem_limit_bytes=vmem_limit,
        ),
        cost_estimate=pl.CostEstimate(
            flops=flops,
            transcendentals=transcendentals,
            bytes_accessed=bytes_accessed,
        ),
    )(*operands)

    return out_p[:B, :out_dim].astype(x.dtype)


# ---------------------------------------------------------------------------
# Parameter construction (mimics nn.Linear default init) + TPU padding
# ---------------------------------------------------------------------------
def init_mlp_params(sizes, key, dtype=jnp.float32):
    """Weights stored as [in, out] (transpose of PyTorch's [out, in])."""
    params = []
    for i in range(len(sizes) - 1):
        fan_in, fan_out = sizes[i], sizes[i + 1]
        key, kw, kb = jax.random.split(key, 3)
        bound = 1.0 / float(fan_in) ** 0.5
        w = jax.random.uniform(kw, (fan_in, fan_out), dtype, -bound, bound)
        b = jax.random.uniform(kb, (1, fan_out), dtype, -bound, bound)
        params.append((w, b))
    return params


def pad_params_for_tpu(params):
    """Zero-pad feature dims to 128-lane multiples; weights in bf16, bias f32."""
    padded = []
    for w, b in params:
        din, dout = w.shape
        din_p, dout_p = _round_up(din, _LANE), _round_up(dout, _LANE)
        w_p = (jnp.zeros((din_p, dout_p), jnp.bfloat16)
               .at[:din, :dout].set(w.astype(jnp.bfloat16)))
        b_p = (jnp.zeros((1, dout_p), jnp.float32)
               .at[:, :dout].set(b.astype(jnp.float32)))
        padded.append((w_p, b_p))
    return padded


# ---------------------------------------------------------------------------
# References
# ---------------------------------------------------------------------------
def mlp_reference_f32(x, params):
    h = x
    for i, (w, b) in enumerate(params):
        h = h @ w + b
        if i < len(params) - 1:
            h = jnp.tanh(h)
    return h


def mlp_reference_bf16(x, params):
    """Numerics-matched: bf16 matmul inputs, f32 accum, bf16 streamed output."""
    h = x.astype(jnp.bfloat16)
    for i, (w, b) in enumerate(params):
        y = jnp.dot(h, w.astype(jnp.bfloat16),
                    preferred_element_type=jnp.float32) + b.astype(jnp.float32)
        if i < len(params) - 1:
            h = jnp.tanh(y).astype(jnp.bfloat16)
        else:
            h = y
    return h.astype(jnp.bfloat16).astype(x.dtype)


if __name__ == "__main__":
    sizes = (32, 64, 48, 16)   # input dim 32, two hidden layers, output dim 16
    key = jax.random.PRNGKey(0)
    params = init_mlp_params(sizes, key)
    padded_params = pad_params_for_tpu(params)

    # Case 1: small batch (single tile).
    key, kx = jax.random.split(key)
    x = jax.random.normal(kx, (8, sizes[0]), jnp.float32)
    out = jax.block_until_ready(mlp_forward_pallas(x, padded_params, sizes[-1]))
    assert out.shape == (8, sizes[-1])
    ref_match = mlp_reference_bf16(x, params)
    assert jnp.allclose(out, ref_match, atol=2e-3, rtol=2e-3), (
        float(jnp.max(jnp.abs(out - ref_match))))
    ref_f32 = mlp_reference_f32(x, params)
    assert jnp.allclose(out, ref_f32, atol=5e-2, rtol=5e-2), (
        float(jnp.max(jnp.abs(out - ref_f32))))

    # Case 2: larger, non-multiple batch (multi-tile grid, padding hugs B,
    # >=2 grid steps for the megacore 'parallel' axis).
    key, kx2 = jax.random.split(key)
    x2 = jax.random.normal(kx2, (300, sizes[0]), jnp.float32)
    out2 = jax.block_until_ready(mlp_forward_pallas(x2, padded_params, sizes[-1]))
    assert out2.shape == (300, sizes[-1])
    ref2 = mlp_reference_bf16(x2, params)
    assert jnp.allclose(out2, ref2, atol=2e-3, rtol=2e-3), (
        float(jnp.max(jnp.abs(out2 - ref2))))

    print("KERNEL_OK")
</pallas_src>

<mosaic_0001>
module attributes {stable_mosaic.version = 11 : i64} {
  func.func @_mlp_fused_kernel(%arg0: i32, %arg1: memref<16x128xbf16, #tpu.memory_space<vmem>>, %arg2: memref<128x128xbf16, #tpu.memory_space<vmem>>, %arg3: memref<1x128xf32, #tpu.memory_space<vmem>>, %arg4: memref<128x128xbf16, #tpu.memory_space<vmem>>, %arg5: memref<1x128xf32, #tpu.memory_space<vmem>>, %arg6: memref<128x128xbf16, #tpu.memory_space<vmem>>, %arg7: memref<1x128xf32, #tpu.memory_space<vmem>>, %arg8: memref<16x128xbf16, #tpu.memory_space<vmem>>) attributes {dimension_semantics = [#tpu.dimension_semantics<parallel>], iteration_bounds = array<i64: 1>, scalar_prefetch = 0 : i64, scratch_operands = 0 : i64, tpu.core_type = #tpu.core_type<tc>, window_params = [{transform_indices = @transform_0, window_bounds = array<i64: 16, 128>}, {pipeline_mode = #tpu.pipeline_mode<synchronous>, transform_indices = @transform_1, window_bounds = array<i64: 128, 128>}, {pipeline_mode = #tpu.pipeline_mode<synchronous>, transform_indices = @transform_2, window_bounds = array<i64: 1, 128>}, {pipeline_mode = #tpu.pipeline_mode<synchronous>, transform_indices = @transform_3, window_bounds = array<i64: 128, 128>}, {pipeline_mode = #tpu.pipeline_mode<synchronous>, transform_indices = @transform_4, window_bounds = array<i64: 1, 128>}, {pipeline_mode = #tpu.pipeline_mode<synchronous>, transform_indices = @transform_5, window_bounds = array<i64: 128, 128>}, {pipeline_mode = #tpu.pipeline_mode<synchronous>, transform_indices = @transform_6, window_bounds = array<i64: 1, 128>}, {transform_indices = @transform_7, window_bounds = array<i64: 16, 128>}]} {
    %c0 = arith.constant 0 : index
    %c0_0 = arith.constant 0 : index
    %0 = vector.load %arg1[%c0, %c0_0] : memref<16x128xbf16, #tpu.memory_space<vmem>>, vector<16x128xbf16>
    %c0_1 = arith.constant 0 : index
    %c0_2 = arith.constant 0 : index
    %1 = vector.load %arg2[%c0_1, %c0_2] : memref<128x128xbf16, #tpu.memory_space<vmem>>, vector<128x128xbf16>
    %c0_3 = arith.constant 0 : index
    %c0_4 = arith.constant 0 : index
    %2 = vector.load %arg3[%c0_3, %c0_4] : memref<1x128xf32, #tpu.memory_space<vmem>>, vector<1x128xf32>
    %cst = arith.constant dense<0.000000e+00> : vector<16x128xf32>
    %3 = tpu.matmul %0, %1, %cst {dimension_numbers = #tpu.dot_dimension_numbers<[1], [0], [0], [1], [0, 0, 1, 1], [], []>} : vector<16x128xbf16>, vector<128x128xbf16>, vector<16x128xf32> -> vector<16x128xf32>
    %4 = vector.broadcast %2 : vector<1x128xf32> to vector<16x128xf32>
    %5 = arith.addf %3, %4 : vector<16x128xf32>
    %6 = math.tanh %5 : vector<16x128xf32>
    %7 = arith.truncf %6 : vector<16x128xf32> to vector<16x128xbf16>
    %c0_5 = arith.constant 0 : index
    %c0_6 = arith.constant 0 : index
    %8 = vector.load %arg4[%c0_5, %c0_6] : memref<128x128xbf16, #tpu.memory_space<vmem>>, vector<128x128xbf16>
    %c0_7 = arith.constant 0 : index
    %c0_8 = arith.constant 0 : index
    %9 = vector.load %arg5[%c0_7, %c0_8] : memref<1x128xf32, #tpu.memory_space<vmem>>, vector<1x128xf32>
    %cst_9 = arith.constant dense<0.000000e+00> : vector<16x128xf32>
    %10 = tpu.matmul %7, %8, %cst_9 {dimension_numbers = #tpu.dot_dimension_numbers<[1], [0], [0], [1], [0, 0, 1, 1], [], []>} : vector<16x128xbf16>, vector<128x128xbf16>, vector<16x128xf32> -> vector<16x128xf32>
    %11 = vector.broadcast %9 : vector<1x128xf32> to vector<16x128xf32>
    %12 = arith.addf %10, %11 : vector<16x128xf32>
    %13 = math.tanh %12 : vector<16x128xf32>
    %14 = arith.truncf %13 : vector<16x128xf32> to vector<16x128xbf16>
    %c0_10 = arith.constant 0 : index
    %c0_11 = arith.constant 0 : index
    %15 = vector.load %arg6[%c0_10, %c0_11] : memref<128x128xbf16, #tpu.memory_space<vmem>>, vector<128x128xbf16>
    %c0_12 = arith.constant 0 : index
    %c0_13 = arith.constant 0 : index
    %16 = vector.load %arg7[%c0_12, %c0_13] : memref<1x128xf32, #tpu.memory_space<vmem>>, vector<1x128xf32>
    %cst_14 = arith.constant dense<0.000000e+00> : vector<16x128xf32>
    %17 = tpu.matmul %14, %15, %cst_14 {dimension_numbers = #tpu.dot_dimension_numbers<[1], [0], [0], [1], [0, 0, 1, 1], [], []>} : vector<16x128xbf16>, vector<128x128xbf16>, vector<16x128xf32> -> vector<16x128xf32>
    %18 = vector.broadcast %16 : vector<1x128xf32> to vector<16x128xf32>
    %19 = arith.addf %17, %18 : vector<16x128xf32>
    %20 = arith.truncf %19 : vector<16x128xf32> to vector<16x128xbf16>
    %c0_15 = arith.constant 0 : index
    %c0_16 = arith.constant 0 : index
    %21 = vector.load %arg8[%c0_15, %c0_16] : memref<16x128xbf16, #tpu.memory_space<vmem>>, vector<16x128xbf16>
    tpu.vector_store %arg8[%c0_15, %c0_16], %20 {strides = array<i32>} : memref<16x128xbf16, #tpu.memory_space<vmem>>, vector<16x128xbf16>,
    return
  }
  func.func @transform_0(%arg0: i32) -> (i32, i32) {
    %c0_i32 = arith.constant 0 : i32
    %c0_i32_0 = arith.constant 0 : i32
    return %arg0, %c0_i32 : i32, i32
  }
  func.func @transform_1(%arg0: i32) -> (i32, i32) {
    %c0_i32 = arith.constant 0 : i32
    %c0_i32_0 = arith.constant 0 : i32
    %c0_i32_1 = arith.constant 0 : i32
    return %c0_i32, %c0_i32_0 : i32, i32
  }
  func.func @transform_2(%arg0: i32) -> (i32, i32) {
    %c0_i32 = arith.constant 0 : i32
    %c0_i32_0 = arith.constant 0 : i32
    %c0_i32_1 = arith.constant 0 : i32
    return %c0_i32, %c0_i32_0 : i32, i32
  }
  func.func @transform_3(%arg0: i32) -> (i32, i32) {
    %c0_i32 = arith.constant 0 : i32
    %c0_i32_0 = arith.constant 0 : i32
    %c0_i32_1 = arith.constant 0 : i32
    return %c0_i32, %c0_i32_0 : i32, i32
  }
  func.func @transform_4(%arg0: i32) -> (i32, i32) {
    %c0_i32 = arith.constant 0 : i32
    %c0_i32_0 = arith.constant 0 : i32
    %c0_i32_1 = arith.constant 0 : i32
    return %c0_i32, %c0_i32_0 : i32, i32
  }
  func.func @transform_5(%arg0: i32) -> (i32, i32) {
    %c0_i32 = arith.constant 0 : i32
    %c0_i32_0 = arith.constant 0 : i32
    %c0_i32_1 = arith.constant 0 : i32
    return %c0_i32, %c0_i32_0 : i32, i32
  }
  func.func @transform_6(%arg0: i32) -> (i32, i32) {
    %c0_i32 = arith.constant 0 : i32
    %c0_i32_0 = arith.constant 0 : i32
    %c0_i32_1 = arith.constant 0 : i32
    return %c0_i32, %c0_i32_0 : i32, i32
  }
  func.func @transform_7(%arg0: i32) -> (i32, i32) {
    %c0_i32 = arith.constant 0 : i32
    %c0_i32_0 = arith.constant 0 : i32
    return %arg0, %c0_i32 : i32, i32
  }
}

</mosaic_0001>

<bundles_post_ra>
// kernel: tpu_custom_call.1
= control target key start
LH: loop header
LB: loop body
LE: loop exit
PB: predicated region body
PF: predicated region fallthrough
CT: control target
= control target key end

     0   :  { %12 = vsyncpa [#allocation3], 0  ;;  %s854_s0 = inlined_call_operand.hbm [shape: bf16[16,128], index: 0, kind: input, shape index: {}]   ;;  %s855_s1 = inlined_call_operand.hbm [shape: bf16[128,128], index: 1, kind: input, shape index: {}]   ;;  %s856_s2 = inlined_call_operand.vmem [shape: f32[1,128], index: 2, kind: input, shape index: {}]   ;;  %s857_s3 = inlined_call_operand.hbm [shape: bf16[128,128], index: 3, kind: input, shape index: {}]   ;;  %s858_s4 = inlined_call_operand.vmem [shape: f32[1,128], index: 4, kind: input, shape index: {}]   ;;  %s859_s5 = inlined_call_operand.hbm [shape: bf16[128,128], index: 5, kind: input, shape index: {}]   ;;  %s860_s6 = inlined_call_operand.vmem [shape: f32[1,128], index: 6, kind: input, shape index: {}]   ;;  %s861_s7 = inlined_call_operand.hbm [shape: bf16[16,128], index: 7, kind: output, shape index: {}]  }
   0x1   :  { %13 = vsyncpa [#allocation6], 0 }
   0x2   :  { %14 = vsyncpa [#allocation9], 0 }
   0x3   :  { %15 = vsyncpa [#allocation4], 0  ;;  %s736_s24 = smov [#allocation5]   ;;  %s737_s26 = smov [#allocation2]  }
   0x4   :  { %s33_s25 = sshll.u32 %s736_s24, 4  ;;  %s21_s27 = sshll.u32 %s737_s26, 4  ;;  %s34_s25 = int_to_ptr.vmem [resolvable:$true] %s33_s25  ;;  %s22_s27 = int_to_ptr.vmem [resolvable:$true] %s21_s27 }
   0x5   :  { %s636_s28 = scalar_lea.vmem %s34_s25, 1024  ;;  %p641_p1 = scmp.lt.s32.totalorder %s34_s25, %s34_s25 }
   0x6   :  { %p637_p0 = scmp.ne.s32.totalorder %s34_s25, %s636_s28  ;;  %p642_p2 = scmp.lt.s32.totalorder %s636_s28, %s636_s28 }
   0x8   :  { %p643_p3 = por %p642_p2, %p641_p1 }
   0xa   :  { %p644_p4 = pnand %p643_p3, %p637_p0 }
   0xc   :  { %647 = shalt.err (!%p644_p4)
}
   0xd   :  { %s738_s29 = smov 64   ;;  %s739_s30 = smov 4  }
   0xe   :  { %39 = dma.hbm_to_vmem [thread:$0]  %s855_s1, 1024, %s34_s25, [#allocation6], %s738_s29, %s738_s29, %s739_s30  }
   0xf   :  { %s656_s10 = scalar_lea.vmem %s22_s27, 128  ;;  %p661_p6 = scmp.lt.s32.totalorder %s22_s27, %s22_s27 }
  0x10   :  { %p657_p5 = scmp.ne.s32.totalorder %s22_s27, %s656_s10  ;;  %p662_p7 = scmp.lt.s32.totalorder %s656_s10, %s656_s10 }
  0x12   :  { %p663_p8 = por %p662_p7, %p661_p6 }
  0x14   :  { %p664_p9 = pnand %p663_p8, %p657_p5 }
  0x16   :  { %667 = shalt.err (!%p664_p9)
}
  0x17   :  { %27 = dma.hbm_to_vmem [thread:$0]  %s854_s0, 128, %s22_s27, [#allocation3], %s738_s29, %s738_s29, %s739_s30  }
  0x18   :  { %s740_s13 = smov [#allocation7]   ;;  %s741_s15 = smov [#allocation8]  }
  0x19   :  { %s47_s14 = sshll.u32 %s740_s13, 4  ;;  %s61_s16 = sshll.u32 %s741_s15, 4  ;;  %s48_s14 = int_to_ptr.vmem [resolvable:$true] %s47_s14  ;;  %s62_s16 = int_to_ptr.vmem [resolvable:$true] %s61_s16 }
  0x1a   :  { %s676_s1 = scalar_lea.vmem %s48_s14, 1024  ;;  %p681_p11 = scmp.lt.s32.totalorder %s48_s14, %s48_s14 }
  0x1b   :  { %p677_p10 = scmp.ne.s32.totalorder %s48_s14, %s676_s1  ;;  %p682_p12 = scmp.lt.s32.totalorder %s676_s1, %s676_s1 }
  0x1d   :  { %p683_p13 = por %p682_p12, %p681_p11 }
  0x1f   :  { %p684_p0 = pnand %p683_p13, %p677_p10 }
  0x21   :  { %687 = shalt.err (!%p684_p0)
}
  0x22   :  { %53 = dma.hbm_to_vmem [thread:$0]  %s857_s3, 1024, %s48_s14, [#allocation6], %s738_s29, %s738_s29, %s739_s30  }
  0x23   :  { %s696_s0 = scalar_lea.vmem %s62_s16, 1024  ;;  %p701_p2 = scmp.lt.s32.totalorder %s62_s16, %s62_s16 }
  0x24   :  { %p697_p1 = scmp.ne.s32.totalorder %s62_s16, %s696_s0  ;;  %p702_p3 = scmp.lt.s32.totalorder %s696_s0, %s696_s0 }
  0x26   :  { %p703_p4 = por %p702_p3, %p701_p2 }
  0x28   :  { %p704_p5 = pnand %p703_p4, %p697_p1 }
  0x2a   :  { %707 = shalt.err (!%p704_p5)
}
  0x2b   :  { %67 = dma.hbm_to_vmem [thread:$0]  %s859_s5, 1024, %s62_s16, [#allocation9], %s738_s29, %s738_s29, %s739_s30  }
  0x2c   :  { %728 = dma.done.wait [#allocation3], 128  }
  0x2d   :  { %729 = vsyncadd [#allocation3], 4294967168 }
  0x2e   :  { %730 = dma.done.wait [#allocation6], 2048  }
  0x2f   :  { %731 = vsyncadd [#allocation6], 4294965248 }
  0x30   :  { %732 = dma.done.wait [#allocation9], 1024  }
  0x31   :  { %733 = vsyncadd [#allocation9], 4294966272  ;;  %v742_v0 = vmov 0.0   ;;  %vm743_vm0 = vmmov 0   ;;  %v595_v1 = vld [vmem:[#allocation5 + $0x38] sm:$0xff]   ;;  %v596_v2 = vld [vmem:[#allocation5 + $0x30] sm:$0xff]  }
  0x32   :  { %526 = vmatprep.subr.bf16.mxu0 %v742_v0  ;;  %542 = vmatprep.mubr.msk.bf16.mxu0 %vm743_vm0, %v742_v0  ;;  %v597_v3 = vld [vmem:[#allocation5 + $0x28] sm:$0xff]   ;;  %v604_v4 = vld [vmem:[#allocation7 + $0x38] sm:$0xff]   ;;  %v598_v5 = vld [vmem:[#allocation5 + $0x20] sm:$0xff]  }
  0x33   :  { %546 = vmatprep.subr.bf16.mxu1 %v742_v0  ;;  %562 = vmatprep.mubr.msk.bf16.mxu1 %vm743_vm0, %v742_v0  ;;  %v605_v6 = vld [vmem:[#allocation7 + $0x30] sm:$0xff]   ;;  %v599_v7 = vld [vmem:[#allocation5 + $0x18] sm:$0xff]   ;;  %v601_v9 = vld [vmem:[#allocation5 + $0x8] sm:$0xff]  }
  0x34   :  { %527 = vmatpush3.bf16.msra.mxu0 %v595_v1  ;;  %547 = vmatpush3.bf16.msra.mxu1 %v604_v4  ;;  %v600_v8 = vld [vmem:[#allocation5 + $0x10] sm:$0xff]   ;;  %v602_v10 = vld [vmem:[#allocation5] sm:$0xff]   ;;  %v603_v11 = vld [vmem:[#allocation2] sm:$0xff]  }
  0x35   :  { %528 = vmatprep.subr.bf16.mxu0 %v742_v0  ;;  %548 = vmatprep.subr.bf16.mxu1 %v742_v0  ;;  %v606_v12 = vld [vmem:[#allocation7 + $0x28] sm:$0xff]   ;;  %v607_v13 = vld [vmem:[#allocation7 + $0x20] sm:$0xff]   ;;  %v608_v14 = vld [vmem:[#allocation7 + $0x18] sm:$0xff]  }
  0x36   :  { %v609_v15 = vld [vmem:[#allocation7 + $0x10] sm:$0xff]   ;;  %v610_v16 = vld [vmem:[#allocation7 + $0x8] sm:$0xff]   ;;  %v611_v17 = vld [vmem:[#allocation7] sm:$0xff]  }
  0x37   :  { %v612_v18 = vld [vmem:[#allocation8 + $0x38] sm:$0xff]   ;;  %v613_v19 = vld [vmem:[#allocation8 + $0x30] sm:$0xff]   ;;  %v614_v30 = vld [vmem:[#allocation8 + $0x28] sm:$0xff]  }
  0x38   :  { %529 = vmatpush3.bf16.msra.mxu0 %v596_v2  ;;  %549 = vmatpush3.bf16.msra.mxu1 %v605_v6  ;;  %v462_v20 = vld [vmem:[%s856_s2] ss:$0 sm:$0xff]  ;;  %v615_v31 = vld [vmem:[#allocation8 + $0x20] sm:$0xff]   ;;  %v617_v33 = vld [vmem:[#allocation8 + $0x10] sm:$0xff]  }
  0x39   :  { %530 = vmatprep.subr.bf16.mxu0 %v742_v0  ;;  %550 = vmatprep.subr.bf16.mxu1 %v742_v0  ;;  %v616_v32 = vld [vmem:[#allocation8 + $0x18] sm:$0xff]   ;;  %v618_v34 = vld [vmem:[#allocation8 + $0x8] sm:$0xff]   ;;  %v619_v35 = vld [vmem:[#allocation8] sm:$0xff]  }
  0x3a   :  { %v472_v36 = vld [vmem:[%s858_s4] ss:$0 sm:$0xff]  ;;  %s744_s4 = smov [#allocation10]  }
  0x3b   :  { %v481_v47 = vld [vmem:[%s860_s6] ss:$0 sm:$0xff]  ;;  %s448_s24 = sshll.u32 %s744_s4, 4  ;;  %s449_s24 = int_to_ptr.vmem [resolvable:$true] %s448_s24 }
  0x3c   :  { %531 = vmatpush3.bf16.msra.mxu0 %v597_v3  ;;  %551 = vmatpush3.bf16.msra.mxu1 %v606_v12  ;;  %s708_s25 = scalar_lea.vmem %s449_s24, 128  ;;  %p713_p7 = scmp.lt.s32.totalorder %s449_s24, %s449_s24 }
  0x3d   :  { %532 = vmatprep.subr.bf16.mxu0 %v742_v0  ;;  %552 = vmatprep.subr.bf16.mxu1 %v742_v0  ;;  %p709_p6 = scmp.ne.s32.totalorder %s449_s24, %s708_s25  ;;  %p714_p8 = scmp.lt.s32.totalorder %s708_s25, %s708_s25 }
  0x3f   :  { %p715_p9 = por %p714_p8, %p713_p7 }
  0x40   :  { %533 = vmatpush3.bf16.msra.mxu0 %v598_v5  ;;  %553 = vmatpush3.bf16.msra.mxu1 %v607_v13 }
  0x41   :  { %534 = vmatprep.subr.bf16.mxu0 %v742_v0  ;;  %554 = vmatprep.subr.bf16.mxu1 %v742_v0  ;;  %p716_p10 = pnand %p715_p9, %p709_p6 }
  0x44   :  { %535 = vmatpush3.bf16.msra.mxu0 %v599_v7  ;;  %555 = vmatpush3.bf16.msra.mxu1 %v608_v14 }
  0x45   :  { %536 = vmatprep.subr.bf16.mxu0 %v742_v0  ;;  %556 = vmatprep.subr.bf16.mxu1 %v742_v0 }
  0x48   :  { %537 = vmatpush3.bf16.msra.mxu0 %v600_v8  ;;  %557 = vmatpush3.bf16.msra.mxu1 %v609_v15 }
  0x49   :  { %538 = vmatprep.subr.bf16.mxu0 %v742_v0  ;;  %558 = vmatprep.subr.bf16.mxu1 %v742_v0 }
  0x4c   :  { %539 = vmatpush3.bf16.msra.mxu0 %v601_v9  ;;  %559 = vmatpush3.bf16.msra.mxu1 %v610_v16 }
  0x4d   :  { %540 = vmatprep.subr.bf16.mxu0 %v742_v0  ;;  %560 = vmatprep.subr.bf16.mxu1 %v742_v0 }
  0x50   :  { %541 = vmatpush3.bf16.msra.mxu0 %v602_v10  ;;  %561 = vmatpush3.bf16.msra.mxu1 %v611_v17 }
  0x51   :  { %566 = vmatprep.subr.bf16.mxu0 %v742_v0 }
  0x53   :  { %543 = vmatmul.mubr.bf16.vlgmr.msra.gmra.mxu0 %v603_v11 }
  0x54   :  { %582 = vmatprep.mubr.msk.bf16.mxu0 %vm743_vm0, %v742_v0  ;;  %567 = vmatpush3.bf16.msra.mxu0 %v612_v18 }
  0x55   :  { %568 = vmatprep.subr.bf16.mxu0 %v742_v0 }
  0x58   :  { %569 = vmatpush3.bf16.msra.mxu0 %v613_v19 }
  0x59   :  { %570 = vmatprep.subr.bf16.mxu0 %v742_v0 }
  0x5c   :  { %571 = vmatpush3.bf16.msra.mxu0 %v614_v30 }
  0x5d   :  { %572 = vmatprep.subr.bf16.mxu0 %v742_v0 }
  0x60   :  { %573 = vmatpush3.bf16.msra.mxu0 %v615_v31 }
  0x61   :  { %574 = vmatprep.subr.bf16.mxu0 %v742_v0 }
  0x64   :  { %575 = vmatpush3.bf16.msra.mxu0 %v616_v32 }
  0x65   :  { %576 = vmatprep.subr.bf16.mxu0 %v742_v0 }
  0x68   :  { %577 = vmatpush3.bf16.msra.mxu0 %v617_v33 }
  0x69   :  { %578 = vmatprep.subr.bf16.mxu0 %v742_v0 }
  0x6c   :  { %579 = vmatpush3.bf16.msra.mxu0 %v618_v34 }
  0x6d   :  { %580 = vmatprep.subr.bf16.mxu0 %v742_v0 }
  0x70   :  { %581 = vmatpush3.bf16.msra.mxu0 %v619_v35 }
 0x113   :  { %v196_v21 = vpop.f32.mrf.mxu0 }
 0x114   :  { %v197_v22 = vadd.f32 %v462_v20, %v196_v21 }
 0x115   :  { %v544_v23 = vpop.f32.mrf.mxu0 }
 0x116   :  { %620 = vtanh.f32 %v197_v22 }
 0x117   :  { %v199_v24 = vpop.f32.mrf.mxu0 }
 0x118   :  { %v200_v25 = vadd.f32 %v462_v20, %v199_v24 }
 0x119   :  { %v545_v26 = vpop.f32.mrf.mxu0 }
 0x11a   :  { %622 = vtanh.f32 %v200_v25 }
 0x123   :  { %v621_v27 = vpop.eup %620 }
 0x127   :  { %v623_v28 = vpop.eup %622 }
 0x128   :  { %v205_v29 = vpack.c.bf16 %v623_v28, %v621_v27 }
 0x12a   :  { %563 = vmatmul.mubr.bf16.vlgmr.msra.gmra.mxu1 %v205_v29 }
 0x1ea   :  { %v311_v37 = vpop.f32.mrf.mxu1 }
 0x1eb   :  { %v312_v38 = vadd.f32 %v472_v36, %v311_v37 }
 0x1ec   :  { %v564_v39 = vpop.f32.mrf.mxu1 }
 0x1ed   :  { %624 = vtanh.f32 %v312_v38 }
 0x1ee   :  { %v314_v40 = vpop.f32.mrf.mxu1 }
 0x1ef   :  { %v315_v41 = vadd.f32 %v472_v36, %v314_v40 }
 0x1f0   :  { %v565_v42 = vpop.f32.mrf.mxu1 }
 0x1f1   :  { %626 = vtanh.f32 %v315_v41 }
 0x1fa   :  { %v625_v43 = vpop.eup %624 }
 0x1fe   :  { %v627_v44 = vpop.eup %626 }
 0x1ff   :  { %v320_v45 = vpack.c.bf16 %v627_v44, %v625_v43 }
 0x201   :  { %583 = vmatmul.mubr.bf16.vlgmr.msra.gmra.mxu0 %v320_v45 }
 0x2c1   :  { %v426_v46 = vpop.f32.mrf.mxu0 }
 0x2c2   :  { %v427_v50 = vadd.f32 %v481_v47, %v426_v46 }
 0x2c3   :  { %v584_v48 = vpop.f32.mrf.mxu0 }
 0x2c5   :  { %v429_v49 = vpop.f32.mrf.mxu0 }
 0x2c6   :  { %v430_v51 = vadd.f32 %v481_v47, %v429_v49 }
 0x2c7   :  { %v585_v52 = vpop.f32.mrf.mxu0 }
 0x2c8   :  { %v497_v53 = vpack.c.bf16 %v430_v51, %v427_v50 }
 0x2ca   :  { %498 = vst [vmem:[#allocation10] sm:$0xff] %v497_v53  }
 0x2cb   :  { %719 = shalt.err (!%p716_p10)
}
 0x2cc   :  { %454 = dma.vmem_to_hbm [thread:$0]  %s449_s24, 128, %s861_s7, [#allocation4], %s738_s29, %s738_s29, %s739_s30  }
 0x2cd   :  { %734 = dma.done.wait [#allocation4], 128  }
 0x2ce   :  { %735 = vsyncadd [#allocation4], 4294967168 }
 0x2cf   :  { %458 = vsyncpa [#allocation3], 1 }
 0x2d0   :  { %459 = vsyncpa [#allocation6], 1 }
 0x2d1   :  { %460 = vsyncpa [#allocation9], 1 }
 0x2d2   :  { %461 = vsyncpa [#allocation4], 1 }

</bundles_post_ra>
